<compile_context>
chip_gen: v6e
topology: v6e:2x2x1
jax: 0.10.0
libtpu: 0.0.40
codegen_flags: <defaults>
</compile_context>

<pallas_src>
import jax
import jax.numpy as jnp
from jax.experimental import pallas as pl
from jax.experimental.pallas import tpu as pltpu


def _pick_tile(dim: int, granule: int, max_tile: int) -> int:
    """Largest multiple of `granule` that divides `dim` and is <= max_tile.

    Falls back to the full dimension (always a legal BlockSpec block) when no
    such divisor exists (e.g. `dim` not a multiple of `granule`).
    """
    if dim <= max_tile:
        return dim
    if dim % granule != 0:
        return dim
    start = (max_tile // granule) * granule
    for cand in range(start, granule - 1, -granule):
        if dim % cand == 0:
            return cand
    return dim


def _make_kernel(coef: float):
    """Builds the kernel body; coef is fixed at module construction (as in
    the PyTorch module's registered buffer), so baking it in is fine."""

    def kernel(x_ref, o_ref, carry_ref):
        # x_ref / o_ref: (BB, TT) lane-dense tiles; carry_ref: (BB, 1) VMEM.
        t = pl.program_id(1)
        x = x_ref[...]

        # First time-tile of each batch block: reflect pad -> x_pad[-1] = x[1].
        @pl.when(t == 0)
        def _():
            carry_ref[...] = x[:, 1:2]

        boundary = carry_ref[...]                     # x[b, t_tile_start - 1]
        # prev[:, j] = x[:, j-1], with the tile boundary supplied by carry.
        prev = jnp.concatenate([boundary, x[:, :-1]], axis=1)

        c = jnp.asarray(coef, dtype=x.dtype)
        o_ref[...] = x - c * prev

        # Carry the last sample into the next time tile of this batch block.
        carry_ref[...] = x[:, -1:]

    return kernel


def pre_emphasis(
    x: jax.Array,
    coef: float = 0.95,
    *,
    max_time_block: int = 2048,
    max_batch_block: int = 256,
) -> jax.Array:
    """JAX/Pallas equivalent of PreEmphasis.forward.

    Args:
      x: (B, T) float32 signal, T >= 2.
    Returns:
      (B, 1, T) float32, matching F.conv1d output layout.
    """
    assert x.ndim == 2, "The number of dimensions of input tensor must be 2!"
    B, T = x.shape
    assert T >= 2, "reflect padding requires at least 2 samples along time"

    BB = _pick_tile(B, 8, max_batch_block)      # sublane axis: multiple of 8 or full B
    TT = _pick_tile(T, 128, max_time_block)     # lane axis: multiple of 128 or full T
    grid = (B // BB, T // TT)

    y = pl.pallas_call(
        _make_kernel(coef),
        out_shape=jax.ShapeDtypeStruct((B, T), x.dtype),
        grid=grid,
        in_specs=[pl.BlockSpec((BB, TT), lambda b, t: (b, t))],
        out_specs=pl.BlockSpec((BB, TT), lambda b, t: (b, t)),
        scratch_shapes=[pltpu.VMEM((BB, 1), x.dtype)],
        compiler_params=pltpu.CompilerParams(
            # batch tiles are independent (megacore-shardable);
            # time tiles are sequential because of the boundary carry.
            dimension_semantics=("parallel", "arbitrary"),
        ),
    )(x)

    # conv1d output keeps the singleton channel dim.
    return y[:, None, :]


def pre_emphasis_reference(x: jax.Array, coef: float = 0.95) -> jax.Array:
    """Pure-JAX reference mirroring the PyTorch module exactly."""
    xpad = jnp.concatenate([x[:, 1:2], x], axis=1)
    y = xpad[:, 1:] - coef * xpad[:, :-1]
    return y[:, None, :]


if __name__ == "__main__":
    key = jax.random.PRNGKey(0)

    # Case 1: small shape, single tile (BB = B, TT = T).
    B, T = 4, 256
    x = jax.random.normal(key, (B, T), dtype=jnp.float32)
    out = jax.block_until_ready(pre_emphasis(x, coef=0.95))
    ref = pre_emphasis_reference(x, coef=0.95)
    assert out.shape == (B, 1, T), out.shape
    assert jnp.allclose(out, ref, atol=1e-6, rtol=1e-6), "mismatch vs reference (case 1)"

    # Case 2: force batch + time tiling to exercise the cross-tile boundary
    # carry and the 2-D grid path.
    B2, T2 = 16, 512
    x2 = jax.random.normal(jax.random.PRNGKey(0), (B2, T2), dtype=jnp.float32)
    out2 = jax.block_until_ready(
        pre_emphasis(x2, coef=0.95, max_time_block=128, max_batch_block=8)
    )
    ref2 = pre_emphasis_reference(x2, coef=0.95)
    assert out2.shape == (B2, 1, T2), out2.shape
    assert jnp.allclose(out2, ref2, atol=1e-6, rtol=1e-6), "mismatch vs reference (case 2)"

    print("KERNEL_OK")
</pallas_src>

<mosaic_0001>
module attributes {stable_mosaic.version = 11 : i64} {
  func.func @kernel(%arg0: i32, %arg1: i32, %arg2: memref<4x256xf32, #tpu.memory_space<vmem>>, %arg3: memref<4x256xf32, #tpu.memory_space<vmem>>, %arg4: memref<4x1xf32, #tpu.memory_space<vmem>>) attributes {dimension_semantics = [#tpu.dimension_semantics<parallel>, #tpu.dimension_semantics<arbitrary>], iteration_bounds = array<i64: 1, 1>, scalar_prefetch = 0 : i64, scratch_operands = 1 : i64, tpu.core_type = #tpu.core_type<tc>, window_params = [{transform_indices = @transform_0, window_bounds = array<i64: 4, 256>}, {transform_indices = @transform_1, window_bounds = array<i64: 4, 256>}]} {
    %c0 = arith.constant 0 : index
    %c0_0 = arith.constant 0 : index
    %0 = vector.load %arg2[%c0, %c0_0] : memref<4x256xf32, #tpu.memory_space<vmem>>, vector<4x256xf32>
    %c0_i32 = arith.constant 0 : i32
    %1 = arith.cmpi eq, %arg1, %c0_i32 : i32
    %2 = arith.extui %1 : i1 to i32
    %c0_i32_1 = arith.constant 0 : i32
    %3 = arith.cmpi ne, %2, %c0_i32_1 : i32
    scf.if %3 {
      %13 = vector.extract_strided_slice %0 {offsets = [0, 1], sizes = [4, 1], strides = [1, 1]} : vector<4x256xf32> to vector<4x1xf32>
      %c0_8 = arith.constant 0 : index
      %c0_9 = arith.constant 0 : index
      %14 = vector.load %arg4[%c0_8, %c0_9] : memref<4x1xf32, #tpu.memory_space<vmem>>, vector<4x1xf32>
      tpu.vector_store %arg4[%c0_8, %c0_9], %13 {strides = array<i32>} : memref<4x1xf32, #tpu.memory_space<vmem>>, vector<4x1xf32>,
    } else {
    }
    %c0_2 = arith.constant 0 : index
    %c0_3 = arith.constant 0 : index
    %4 = vector.load %arg4[%c0_2, %c0_3] : memref<4x1xf32, #tpu.memory_space<vmem>>, vector<4x1xf32>
    %5 = vector.extract_strided_slice %0 {offsets = [0, 0], sizes = [4, 255], strides = [1, 1]} : vector<4x256xf32> to vector<4x255xf32>
    %6 = tpu.concatenate %4, %5 in 1 : vector<4x1xf32>, vector<4x255xf32> -> vector<4x256xf32>
    %cst = arith.constant 0.949999988 : f32
    %7 = vector.broadcast %cst : f32 to vector<4x256xf32>
    %8 = arith.mulf %7, %6 : vector<4x256xf32>
    %9 = arith.subf %0, %8 : vector<4x256xf32>
    %c0_4 = arith.constant 0 : index
    %c0_5 = arith.constant 0 : index
    %10 = vector.load %arg3[%c0_4, %c0_5] : memref<4x256xf32, #tpu.memory_space<vmem>>, vector<4x256xf32>
    tpu.vector_store %arg3[%c0_4, %c0_5], %9 {strides = array<i32>} : memref<4x256xf32, #tpu.memory_space<vmem>>, vector<4x256xf32>,
    %11 = vector.extract_strided_slice %0 {offsets = [0, 255], sizes = [4, 1], strides = [1, 1]} : vector<4x256xf32> to vector<4x1xf32>
    %c0_6 = arith.constant 0 : index
    %c0_7 = arith.constant 0 : index
    %12 = vector.load %arg4[%c0_6, %c0_7] : memref<4x1xf32, #tpu.memory_space<vmem>>, vector<4x1xf32>
    tpu.vector_store %arg4[%c0_6, %c0_7], %11 {strides = array<i32>} : memref<4x1xf32, #tpu.memory_space<vmem>>, vector<4x1xf32>,
    return
  }
  func.func @transform_0(%arg0: i32, %arg1: i32) -> (i32, i32) {
    %c0_i32 = arith.constant 0 : i32
    return %arg0, %arg1 : i32, i32
  }
  func.func @transform_1(%arg0: i32, %arg1: i32) -> (i32, i32) {
    %c0_i32 = arith.constant 0 : i32
    return %arg0, %arg1 : i32, i32
  }
}

</mosaic_0001>

<bundles_post_ra>
// kernel: tpu_custom_call.1
= control target key start
LH: loop header
LB: loop body
LE: loop exit
PB: predicated region body
PF: predicated region fallthrough
CT: control target
= control target key end

     0   :  { %6 = vsyncpa [#allocation4], 0  ;;  %s139_s0 = inlined_call_operand.hbm [shape: f32[4,256], index: 0, kind: input, shape index: {}]   ;;  %s140_s1 = inlined_call_operand.hbm [shape: f32[4,256], index: 1, kind: output, shape index: {}]  }
   0x1   :  { %7 = vsyncpa [#allocation5], 0  ;;  %s119_s6 = smov [#allocation3]  }
   0x2   :  { %s14_s7 = sshll.u32 %s119_s6, 4  ;;  %s15_s7 = int_to_ptr.vmem [resolvable:$true] %s14_s7 }
   0x3   :  { %s83_s8 = scalar_lea.vmem %s15_s7, 128  ;;  %p88_p1 = scmp.lt.s32.totalorder %s15_s7, %s15_s7 }
   0x4   :  { %p84_p0 = scmp.ne.s32.totalorder %s15_s7, %s83_s8  ;;  %p89_p2 = scmp.lt.s32.totalorder %s83_s8, %s83_s8 }
   0x6   :  { %p90_p3 = por %p89_p2, %p88_p1 }
   0x8   :  { %p91_p4 = pnand %p90_p3, %p84_p0 }
   0xa   :  { %94 = shalt.err (!%p91_p4)
}
   0xb   :  { %17 = dma.hbm_to_vmem [thread:$0]  %s139_s0, 128, %s15_s7, [#allocation4]  }
   0xc   :  { %115 = dma.done.wait [#allocation4], 128  }
   0xd   :  { %116 = vsyncadd [#allocation4], 4294967168  ;;  %v21_v0 = vld [vmem:[#allocation3] sm:$0xff]  ;;  %s120_s11 = smov 127   ;;  %s121_s12 = smov 1   ;;  %vm30_vm0 = vcmask 3072  }
   0xe   :  { %27 = vrot.lane.b32.xlu0 %v21_v0, %s120_s11  ;;  %v34_v1 = vcombine.high %v21_v0, %v21_v0  ;;  %vm39_vm1 = vcmask 7168   ;;  %s122_s0 = smov [#allocation6]  }
   0xf   :  { %s61_s13 = sshll.u32 %s122_s0, 4  ;;  %s62_s13 = int_to_ptr.vmem [resolvable:$true] %s61_s13 }
  0x10   :  { %37 = vrot.lane.b32.xlu1 %v34_v1, %s121_s12  ;;  %s95_s14 = scalar_lea.vmem %s62_s13, 128  ;;  %p100_p6 = scmp.lt.s32.totalorder %s62_s13, %s62_s13 }
  0x11   :  { %p96_p5 = scmp.ne.s32.totalorder %s62_s13, %s95_s14  ;;  %p101_p7 = scmp.lt.s32.totalorder %s95_s14, %s95_s14 }
  0x12   :  { %35 = vrot.lane.b32.xlu0 %v21_v0, %s121_s12 }
  0x13   :  { %p102_p8 = por %p101_p7, %p100_p6 }
  0x15   :  { %p103_p9 = pnand %p102_p8, %p96_p5 }
  0x80   :  { %v28_v2 = vpop.permute.xlu0 %27 }
  0x81   :  { %31 = vst.msk [vmem:[#allocation2] sm:$0xf] %vm30_vm0, %v28_v2 }
  0x82   :  { %v38_v3 = vpop.permute.xlu1 %37 }
  0x84   :  { %v36_v4 = vpop.permute.xlu0 %35 }
  0x85   :  { %v40_v5 = vsel %vm39_vm1, %v36_v4, %v38_v3 }
  0x86   :  { %v45_v7 = vmul.f32 0.95, %v40_v5 }
  0x88   :  { %v32_v6 = vld [vmem:[#allocation2] sm:$0xf] }
  0x89   :  { %v43_v8 = vsel %vm39_vm1, %v32_v6, %v36_v4  ;;  %54 = vst.msk [vmem:[#allocation2] sm:$0xf] %vm30_vm0, %v38_v3 }
  0x8a   :  { %v44_v9 = vmul.f32 0.95, %v43_v8 }
  0x8c   :  { %v48_v10 = vcombine.low %v44_v9, %v45_v7 }
  0x8e   :  { %v50_v11 = vsub.f32 %v21_v0, %v48_v10 }
  0x90   :  { %51 = vst [vmem:[#allocation6] sm:$0xff] %v50_v11 }
  0x91   :  { %106 = shalt.err (!%p103_p9)
}
  0x92   :  { %64 = dma.vmem_to_hbm [thread:$0]  %s62_s13, 128, %s140_s1, [#allocation5]  }
  0x93   :  { %117 = dma.done.wait [#allocation5], 128  }
  0x94   :  { %118 = vsyncadd [#allocation5], 4294967168 }
  0x95   :  { %68 = vsyncpa [#allocation4], 1 }
  0x96   :  { %69 = vsyncpa [#allocation5], 1 }

</bundles_post_ra>
